<compile_context>
chip_gen: v7x
topology: tpu7x:2x2x1
jax: 0.10.0
libtpu: 0.0.40
codegen_flags: <defaults>
</compile_context>

<pallas_src>
import functools

import jax
import jax.numpy as jnp
import numpy as np
from jax.experimental import pallas as pl
from jax.experimental.pallas import tpu as pltpu


# ---------------------------------------------------------------------------
# One-time probe of pltpu.roll's shift convention (jnp.roll-like or reversed).
# ---------------------------------------------------------------------------
@functools.lru_cache(maxsize=None)
def _roll_pulls_from_higher_index():
    """True if pltpu.roll(x, s, axis)[..., j] == x[..., (j + s) % n].

    jnp.roll semantics would instead give x[..., (j - s) % n].  Probing keeps
    the lane-roll based max correct regardless of the lowering's convention.
    """
    def probe(o_ref):
        lane = jax.lax.broadcasted_iota(jnp.float32, (8, 128), 1)
        o_ref[...] = pltpu.roll(lane, 1, axis=1)

    try:
        out = pl.pallas_call(
            probe, out_shape=jax.ShapeDtypeStruct((8, 128), jnp.float32))()
        v = int(jax.device_get(out)[0, 0])
    except Exception:
        return False          # fall back to the documented jnp.roll-like behavior
    return v == 1             # 1 -> pulls from j+shift ; 127 -> jnp.roll-like


# ---------------------------------------------------------------------------
# Constant one-hot compaction matrix (built on host, tiny, bf16).
# ---------------------------------------------------------------------------
def _compaction_matrix(G, W_in, dtype=jnp.bfloat16):
    """S[k, c] = 1 iff lane k holds the finished 4-tap max for output column c.

    A kernel row holds G groups of [image row 2h (W_in) | image row 2h+1 (W_in)];
    after the vertical+horizontal rolls the finished max for (g, w') sits at
    lane g*2*W_in + 2*w'.
    """
    W2 = W_in // 2
    K, Nc = G * 2 * W_in, G * W2
    sel = np.zeros((K, Nc), dtype=np.float32)
    cols = np.arange(Nc)
    src = (cols // W2) * (2 * W_in) + 2 * (cols % W2)
    sel[src, cols] = 1.0
    return jnp.asarray(sel, dtype=dtype)


# ---------------------------------------------------------------------------
# Kernel
# ---------------------------------------------------------------------------
def _make_kernel(shift_v, shift_h, exact_split):
    """x_ref: (tb, K) packed rows; s_ref: (K, Nc) one-hot bf16; o_ref: (tb, Nc)."""
    def kernel(x_ref, s_ref, o_ref):
        x = x_ref[...]                                       # native dtype, no upcast
        # Vertical max (VPU + one constant XLU lane-roll): lane p <- max(x[p], x[p+W]).
        v = jnp.maximum(x, pltpu.roll(x, shift_v, axis=1))
        # Horizontal neighbour max: lane p <- max(v[p], v[p+1]).
        h = jnp.maximum(v, pltpu.roll(v, shift_h, axis=1))
        s = s_ref[...]
        if exact_split:
            # f32/f16 inputs: split h exactly into three bf16 components
            # (h == h1 + h2 + h3) so the one-hot gather is bit-exact using only
            # single-pass bf16 MXU matmuls (no Precision.HIGHEST).
            h32 = h.astype(jnp.float32)
            h1 = h32.astype(jnp.bfloat16)
            r1 = h32 - h1.astype(jnp.float32)
            h2 = r1.astype(jnp.bfloat16)
            h3 = (r1 - h2.astype(jnp.float32)).astype(jnp.bfloat16)
            acc = jnp.dot(h1, s, preferred_element_type=jnp.float32)
            acc = acc + jnp.dot(h2, s, preferred_element_type=jnp.float32)
            acc = acc + jnp.dot(h3, s, preferred_element_type=jnp.float32)
        else:
            # bf16 inputs: a single bf16 pass is already exact for a one-hot gather.
            acc = jnp.dot(h, s, preferred_element_type=jnp.float32)
        o_ref[...] = acc.astype(o_ref.dtype)
    return kernel


# ---------------------------------------------------------------------------
# Wrapper
# ---------------------------------------------------------------------------
def downsample_forward(img):
    """MaxPool2d(kernel_size=2, stride=2) on an NCHW tensor via Pallas."""
    N, C, H, W = img.shape
    H2, W2 = H // 2, W // 2
    assert H2 > 0 and W2 > 0, "MaxPool2d(2) needs H >= 2 and W >= 2"
    if H != 2 * H2 or W != 2 * W2:
        # TODO(synk): odd trailing row/col (PyTorch floors them) costs one HBM slice copy.
        img = img[:, :, : 2 * H2, : 2 * W2]
    W_in = 2 * W2
    R2 = N * C * H2                         # number of pooled output rows

    # Pack G output rows per kernel row so the output lane width G*W2 is >= 128
    # (unmasked stores).  G must divide R2 so the packing stays a FREE reshape
    # (no wrapper-side padding / extra HBM pass).
    g_target = min(max(1, -(-128 // W2)), R2)
    G = 1
    for g in range(g_target, 0, -1):
        if R2 % g == 0:
            G = g
            break
    K, Nc = G * 2 * W_in, G * W2
    RG = R2 // G
    # TODO(synk): for very wide rows (K >~ 4096) the compaction matrix / MXU work
    # grows ~quadratically in W; a width-tiled variant would be preferable there.

    # --- per-generation sizing -------------------------------------------------
    try:
        vmem_cap = getattr(pltpu.get_tpu_info(), "vmem_capacity_bytes", None)
    except Exception:
        vmem_cap = None
    if vmem_cap is not None and vmem_cap >= 100 * 1024 * 1024:   # v5e / v6e (128 MiB VMEM)
        vmem_limit, budget, row_target = 64 << 20, 28 << 20, 1024
    else:                                                        # v7x (64 MiB) / unknown
        vmem_limit, budget, row_target = 32 << 20, 14 << 20, 512

    in_bytes = jnp.dtype(img.dtype).itemsize
    sel_bytes = K * Nc * 2 * 2                  # bf16 compaction matrix, double-buffered
    per_row = 2 * (K + Nc) * in_bytes           # double-buffered input/output rows
    per_row += 4 * K * 4                        # headroom for in-kernel temporaries
    tb = min(row_target, max(8, (budget - sel_bytes) // per_row), RG)
    if RG >= 16:
        if tb >= RG:
            tb = RG // 2                        # keep >= 2 grid steps (2 TCs on v7x)
        tb = max(8, (tb // 8) * 8)              # sublane rule when tb < RG
    else:
        tb = RG                                 # tiny map: one full block (legal any size)
    grid = (pl.cdiv(RG, tb),)                   # ragged tail handled by partial blocks

    # --- roll shift direction (probed once) ------------------------------------
    if _roll_pulls_from_higher_index():
        shift_v, shift_h = W_in, 1
    else:
        shift_v, shift_h = K - W_in, K - 1

    exact_split = jnp.dtype(img.dtype) != jnp.dtype(jnp.bfloat16)
    kernel = _make_kernel(shift_v, shift_h, exact_split)

    x2d = img.reshape(RG, K)                    # free, contiguous view of NCHW
    sel = _compaction_matrix(G, W_in)

    out2d = pl.pallas_call(
        kernel,
        out_shape=jax.ShapeDtypeStruct((RG, Nc), img.dtype),
        grid_spec=pltpu.PrefetchScalarGridSpec(
            num_scalar_prefetch=0,
            grid=grid,
            in_specs=[
                pl.BlockSpec((tb, K), lambda i: (i, 0)),
                pl.BlockSpec((K, Nc), lambda i: (0, 0)),   # constant block: DMA'd once
            ],
            out_specs=pl.BlockSpec((tb, Nc), lambda i: (i, 0)),
        ),
        compiler_params=pltpu.CompilerParams(
            dimension_semantics=("parallel",),
            vmem_limit_bytes=vmem_limit,
        ),
    )(x2d, sel)
    return out2d.reshape(N, C, H2, W2)


def downsample_reference(img):
    """Pure-JAX reference (same math, no Pallas)."""
    N, C, H, W = img.shape
    H2, W2 = H // 2, W // 2
    x = img[:, :, : 2 * H2, : 2 * W2]
    return jnp.max(x.reshape(N, C, H2, 2, W2, 2), axis=(3, 5))


if __name__ == "__main__":
    key = jax.random.PRNGKey(0)
    N, C, H, W = 2, 4, 16, 16
    img = jax.random.normal(key, (N, C, H, W), dtype=jnp.float32)   # genuine f32, no pre-quantize

    out = downsample_forward(img)
    out = jax.block_until_ready(out)

    ref = downsample_reference(img)
    assert out.shape == (N, C, H // 2, W // 2), out.shape
    err = jnp.max(jnp.abs(out - ref))
    assert jnp.allclose(out, ref, atol=1e-6, rtol=1e-6), f"mismatch vs reference: {err}"
    print("KERNEL_OK")
</pallas_src>

<mosaic_0001>
module attributes {stable_mosaic.version = 11 : i64} {
  func.func @kernel(%arg0: i32, %arg1: memref<4x512xf32, #tpu.memory_space<vmem>>, %arg2: memref<512x128xbf16, #tpu.memory_space<vmem>>, %arg3: memref<4x128xf32, #tpu.memory_space<vmem>>) attributes {dimension_semantics = [#tpu.dimension_semantics<parallel>], iteration_bounds = array<i64: 1>, scalar_prefetch = 0 : i64, scratch_operands = 0 : i64, tpu.core_type = #tpu.core_type<tc>, window_params = [{transform_indices = @transform_0, window_bounds = array<i64: 4, 512>}, {pipeline_mode = #tpu.pipeline_mode<synchronous>, transform_indices = @transform_1, window_bounds = array<i64: 512, 128>}, {transform_indices = @transform_2, window_bounds = array<i64: 4, 128>}]} {
    %c0 = arith.constant 0 : index
    %c0_0 = arith.constant 0 : index
    %0 = vector.load %arg1[%c0, %c0_0] : memref<4x512xf32, #tpu.memory_space<vmem>>, vector<4x512xf32>
    %c496_i32 = arith.constant 496 : i32
    %1 = tpu.dynamic_rotate %0 by %c496_i32 dim 1 : vector<4x512xf32>, i32 -> vector<4x512xf32>
    %2 = arith.maximumf %0, %1 : vector<4x512xf32>
    %c511_i32 = arith.constant 511 : i32
    %3 = tpu.dynamic_rotate %2 by %c511_i32 dim 1 : vector<4x512xf32>, i32 -> vector<4x512xf32>
    %4 = arith.maximumf %2, %3 : vector<4x512xf32>
    %c0_1 = arith.constant 0 : index
    %c0_2 = arith.constant 0 : index
    %5 = vector.load %arg2[%c0_1, %c0_2] : memref<512x128xbf16, #tpu.memory_space<vmem>>, vector<512x128xbf16>
    %6 = arith.truncf %4 : vector<4x512xf32> to vector<4x512xbf16>
    %7 = arith.extf %6 : vector<4x512xbf16> to vector<4x512xf32>
    %8 = arith.subf %4, %7 : vector<4x512xf32>
    %9 = arith.truncf %8 : vector<4x512xf32> to vector<4x512xbf16>
    %10 = arith.extf %9 : vector<4x512xbf16> to vector<4x512xf32>
    %11 = arith.subf %8, %10 : vector<4x512xf32>
    %12 = arith.truncf %11 : vector<4x512xf32> to vector<4x512xbf16>
    %cst = arith.constant dense<0.000000e+00> : vector<4x128xf32>
    %13 = tpu.matmul %6, %5, %cst {dimension_numbers = #tpu.dot_dimension_numbers<[1], [0], [0], [1], [0, 0, 1, 1], [], []>} : vector<4x512xbf16>, vector<512x128xbf16>, vector<4x128xf32> -> vector<4x128xf32>
    %cst_3 = arith.constant dense<0.000000e+00> : vector<4x128xf32>
    %14 = tpu.matmul %9, %5, %cst_3 {dimension_numbers = #tpu.dot_dimension_numbers<[1], [0], [0], [1], [0, 0, 1, 1], [], []>} : vector<4x512xbf16>, vector<512x128xbf16>, vector<4x128xf32> -> vector<4x128xf32>
    %15 = arith.addf %13, %14 : vector<4x128xf32>
    %cst_4 = arith.constant dense<0.000000e+00> : vector<4x128xf32>
    %16 = tpu.matmul %12, %5, %cst_4 {dimension_numbers = #tpu.dot_dimension_numbers<[1], [0], [0], [1], [0, 0, 1, 1], [], []>} : vector<4x512xbf16>, vector<512x128xbf16>, vector<4x128xf32> -> vector<4x128xf32>
    %17 = arith.addf %15, %16 : vector<4x128xf32>
    %c0_5 = arith.constant 0 : index
    %c0_6 = arith.constant 0 : index
    %18 = vector.load %arg3[%c0_5, %c0_6] : memref<4x128xf32, #tpu.memory_space<vmem>>, vector<4x128xf32>
    tpu.vector_store %arg3[%c0_5, %c0_6], %17 {strides = array<i32>} : memref<4x128xf32, #tpu.memory_space<vmem>>, vector<4x128xf32>,
    return
  }
  func.func @transform_0(%arg0: i32) -> (i32, i32) {
    %c0_i32 = arith.constant 0 : i32
    %c0_i32_0 = arith.constant 0 : i32
    return %arg0, %c0_i32 : i32, i32
  }
  func.func @transform_1(%arg0: i32) -> (i32, i32) {
    %c0_i32 = arith.constant 0 : i32
    %c0_i32_0 = arith.constant 0 : i32
    %c0_i32_1 = arith.constant 0 : i32
    return %c0_i32, %c0_i32_0 : i32, i32
  }
  func.func @transform_2(%arg0: i32) -> (i32, i32) {
    %c0_i32 = arith.constant 0 : i32
    %c0_i32_0 = arith.constant 0 : i32
    return %arg0, %c0_i32 : i32, i32
  }
}

</mosaic_0001>

<bundles_post_ra>
// kernel: tpu_custom_call.1
= control target key start
LH: loop header
LB: loop body
LE: loop exit
PB: predicated region body
PF: predicated region fallthrough
CT: control target
= control target key end

     0   :  { %7 = vsyncpa [#allocation3], 0  ;;  %s1199_s0 = inlined_call_operand.hbm [shape: f32[4,512], index: 0, kind: input, shape index: {}]   ;;  %s1200_s1 = inlined_call_operand.hbm [shape: bf16[512,128], index: 1, kind: input, shape index: {}]   ;;  %s1201_s2 = inlined_call_operand.hbm [shape: f32[4,128], index: 2, kind: output, shape index: {}]  }
   0x1   :  { %8 = vsyncpa [#allocation6], 0 }
   0x2   :  { %9 = vsyncpa [#allocation4], 0  ;;  %s950_s9 = smov [#allocation2]   ;;  %s951_s11 = smov [#allocation5]  }
   0x3   :  { %s16_s10 = sshll.u32 %s950_s9, 4  ;;  %s25_s12 = sshll.u32 %s951_s11, 4  ;;  %s17_s10 = int_to_ptr.vmem [resolvable:$true] %s16_s10  ;;  %s972_s12 = int_to_ptr.vmem [resolvable:$true] %s25_s12 }
   0x4   :  { %s878_s15 = scalar_lea.hbm %s1199_s0, 256 }
   0x5   :  { %p879_p0 = scmp.ne.s32.totalorder %s1199_s0, %s878_s15  ;;  %p882_p1 = scmp.lt.u32.totalorder %s878_s15, %s1199_s0 }
   0x7   :  { %p884_p2 = pnand %p882_p1, %p879_p0 }
   0x9   :  { %887 = shalt.err (!%p884_p2)
}
   0xa   :  { %s888_s20 = scalar_lea.vmem %s17_s10, 256  ;;  %p893_p4 = scmp.lt.s32.totalorder %s17_s10, %s17_s10 }
   0xb   :  { %p889_p3 = scmp.ne.s32.totalorder %s17_s10, %s888_s20  ;;  %p894_p5 = scmp.lt.s32.totalorder %s888_s20, %s888_s20 }
   0xd   :  { %p895_p6 = por %p894_p5, %p893_p4 }
   0xf   :  { %p896_p7 = pnand %p895_p6, %p889_p3 }
  0x11   :  { %899 = shalt.err (!%p896_p7)
}
  0x12   :  { %19 = dma.hbm_to_vmem [thread:$0]  %s1199_s0, 256, %s17_s10, [#allocation3]  }
  0x13   :  { %s900_s25 = scalar_lea.hbm %s1200_s1, 4096 }
  0x14   :  { %p901_p8 = scmp.ne.s32.totalorder %s1200_s1, %s900_s25  ;;  %p904_p9 = scmp.lt.u32.totalorder %s900_s25, %s1200_s1 }
  0x16   :  { %p906_p10 = pnand %p904_p9, %p901_p8 }
  0x18   :  { %909 = shalt.err (!%p906_p10)
}
  0x19   :  { %s910_s30 = scalar_lea.vmem %s972_s12, 4096  ;;  %p915_p12 = scmp.lt.s32.totalorder %s972_s12, %s972_s12 }
  0x1a   :  { %p911_p11 = scmp.ne.s32.totalorder %s972_s12, %s910_s30  ;;  %p916_p13 = scmp.lt.s32.totalorder %s910_s30, %s910_s30 }
  0x1c   :  { %p917_p0 = por %p916_p13, %p915_p12 }
  0x1e   :  { %p918_p1 = pnand %p917_p0, %p911_p11 }
  0x20   :  { %921 = shalt.err (!%p918_p1)
}
  0x21   :  { %s952_s0 = smov 64   ;;  %s953_s3 = smov 4  }
  0x22   :  { %31 = dma.hbm_to_vmem [thread:$0]  %s1200_s1, 4096, %s972_s12, [#allocation6], %s952_s0, %s952_s0, %s953_s3  }
  0x23   :  { %944 = dma.done.wait [#allocation3], 256  }
  0x24   :  { %945 = vsyncadd [#allocation3], 4294967040 }
  0x25   :  { %946 = dma.done.wait [#allocation6], 4096  }
  0x26   :  { %947 = vsyncadd [#allocation6], 4294963200  ;;  %v1003_v0 = vld [vmem:[#allocation2 + $0x8] sm:$0xff]  ;;  %v1005_v1 = vld [vmem:[#allocation2] sm:$0xff]  ;;  %s954_s6 = smov 112   ;;  %v55_v13 = vlaneseq  ;;  %s955_s1 = smov 127  }
  0x27   :  { %51 = vrot.lane.b32.xlu1 %v1003_v0, %s954_s6  ;;  %47 = vrot.lane.b32.xlu0 %v1005_v1, %s954_s6  ;;  %v44_v2 = vcombine.high %v1003_v0, %v1003_v0  ;;  %v43_v3 = vcombine.high %v1005_v1, %v1005_v1  ;;  %v1013_v4 = vld [vmem:[#allocation5 + $0x40] sm:$0xff]   ;;  %v1021_v8 = vld [vmem:[#allocation5 + $0x48] sm:$0xff]   ;;  %v1035_v12 = vld [vmem:[#allocation5 + $0x50] sm:$0xff]   ;;  %s956_s7 = smov [#allocation7]  }
  0x28   :  { %v1015_v5 = vld [vmem:[#allocation5] sm:$0xff]   ;;  %705 = vmatprep.subr.bf16.mxu0 %v1013_v4  ;;  %v1025_v9 = vld [vmem:[#allocation5 + $0x8] sm:$0xff]   ;;  %v1040_v14 = vld [vmem:[#allocation5 + $0x10] sm:$0xff]   ;;  %v1047_v17 = vand.u32 127, %v55_v13  ;;  %s663_s8 = sshll.u32 %s956_s7, 4  ;;  %s664_s8 = int_to_ptr.vmem [resolvable:$true] %s663_s8 }
  0x29   :  { %v1017_v6 = vld [vmem:[#allocation5 + $0xc0] sm:$0xff]   ;;  %706 = vmatpush3.bf16.msra.mxu0 %v1015_v5  ;;  %v1029_v10 = vld [vmem:[#allocation5 + $0xc8] sm:$0xff]   ;;  %v1042_v15 = vld [vmem:[#allocation5 + $0xd0] sm:$0xff]   ;;  %s922_s9 = scalar_lea.vmem %s664_s8, 64  ;;  %p927_p3 = scmp.lt.s32.totalorder %s664_s8, %s664_s8 }
  0x2a   :  { %v1019_v7 = vld [vmem:[#allocation5 + $0x80] sm:$0xff]   ;;  %727 = vmatprep.subr.bf16.mxu1 %v1017_v6  ;;  %707 = vmatprep.subr.bf16.mxu0 %v1021_v8  ;;  %v1032_v11 = vld [vmem:[#allocation5 + $0x88] sm:$0xff]   ;;  %v1045_v16 = vld [vmem:[#allocation5 + $0x90] sm:$0xff]   ;;  %vm57_vm0 = vcmp.lt.s32.totalorder %v1047_v17, 112  ;;  %vm86_vm1 = vcmp.lt.s32.totalorder %v1047_v17, 127  ;;  %p923_p2 = scmp.ne.s32.totalorder %s664_s8, %s922_s9  ;;  %p928_p4 = scmp.lt.s32.totalorder %s922_s9, %s922_s9 }
  0x2b   :  { %53 = vrot.lane.b32.xlu1 %v44_v2, %s954_s6  ;;  %49 = vrot.lane.b32.xlu0 %v43_v3, %s954_s6  ;;  %v1050_v18 = vld [vmem:[#allocation5 + $0x58] sm:$0xff]   ;;  %v1063_v24 = vld [vmem:[#allocation5 + $0x60] sm:$0xff]   ;;  %v1075_v36 = vld [vmem:[#allocation5 + $0x68] sm:$0xff]  }
  0x2c   :  { %728 = vmatpush3.bf16.msra.mxu1 %v1019_v7  ;;  %v1053_v19 = vld [vmem:[#allocation5 + $0x18] sm:$0xff]   ;;  %v1066_v25 = vld [vmem:[#allocation5 + $0x20] sm:$0xff]   ;;  %v1078_v37 = vld [vmem:[#allocation5 + $0x28] sm:$0xff]   ;;  %p929_p5 = por %p928_p4, %p927_p3 }
  0x2d   :  { %729 = vmatprep.subr.bf16.mxu1 %v1029_v10  ;;  %708 = vmatpush3.bf16.msra.mxu0 %v1025_v9  ;;  %v1056_v22 = vld [vmem:[#allocation5 + $0xd8] sm:$0xff]   ;;  %v1069_v28 = vld [vmem:[#allocation5 + $0xe0] sm:$0xff]   ;;  %v1082_v39 = vld [vmem:[#allocation5 + $0xe8] sm:$0xff]  }
  0x2e   :  { %709 = vmatprep.subr.bf16.mxu0 %v1035_v12  ;;  %v1059_v23 = vld [vmem:[#allocation5 + $0x98] sm:$0xff]   ;;  %v1072_v33 = vld [vmem:[#allocation5 + $0xa0] sm:$0xff]   ;;  %v1085_v40 = vld [vmem:[#allocation5 + $0xa8] sm:$0xff]   ;;  %p930_p6 = pnand %p929_p5, %p923_p2 }
  0x2f   :  { %v1089_v43 = vld [vmem:[#allocation5 + $0x70] sm:$0xff]   ;;  %v1098_v47 = vld [vmem:[#allocation5 + $0x78] sm:$0xff]  }
  0x30   :  { %730 = vmatpush3.bf16.msra.mxu1 %v1032_v11  ;;  %v1091_v44 = vld [vmem:[#allocation5 + $0x30] sm:$0xff]   ;;  %v1101_v48 = vld [vmem:[#allocation5 + $0xf8] sm:$0xff]  }
  0x31   :  { %710 = vmatpush3.bf16.msra.mxu0 %v1040_v14  ;;  %731 = vmatprep.subr.bf16.mxu1 %v1042_v15  ;;  %v1093_v45 = vld [vmem:[#allocation5 + $0xf0] sm:$0xff]   ;;  %v1105_v49 = vld [vmem:[#allocation5 + $0x38] sm:$0xff]  }
  0x32   :  { %711 = vmatprep.subr.bf16.mxu0 %v1050_v18  ;;  %v1096_v46 = vld [vmem:[#allocation5 + $0xb0] sm:$0xff]   ;;  %v1109_v51 = vld [vmem:[#allocation5 + $0xb8] sm:$0xff]  }
  0x34   :  { %732 = vmatpush3.bf16.msra.mxu1 %v1045_v16 }
  0x35   :  { %712 = vmatpush3.bf16.msra.mxu0 %v1053_v19  ;;  %733 = vmatprep.subr.bf16.mxu1 %v1056_v22 }
  0x36   :  { %713 = vmatprep.subr.bf16.mxu0 %v1063_v24 }
  0x38   :  { %734 = vmatpush3.bf16.msra.mxu1 %v1059_v23 }
  0x39   :  { %714 = vmatpush3.bf16.msra.mxu0 %v1066_v25  ;;  %735 = vmatprep.subr.bf16.mxu1 %v1069_v28 }
  0x3a   :  { %715 = vmatprep.subr.bf16.mxu0 %v1075_v36 }
  0x3c   :  { %736 = vmatpush3.bf16.msra.mxu1 %v1072_v33 }
  0x3d   :  { %716 = vmatpush3.bf16.msra.mxu0 %v1078_v37  ;;  %737 = vmatprep.subr.bf16.mxu1 %v1082_v39 }
  0x3e   :  { %717 = vmatprep.subr.bf16.mxu0 %v1089_v43 }
  0x40   :  { %738 = vmatpush3.bf16.msra.mxu1 %v1085_v40 }
  0x41   :  { %718 = vmatpush3.bf16.msra.mxu0 %v1091_v44  ;;  %739 = vmatprep.subr.bf16.mxu1 %v1093_v45 }
  0x42   :  { %719 = vmatprep.subr.bf16.mxu0 %v1098_v47 }
  0x44   :  { %740 = vmatpush3.bf16.msra.mxu1 %v1096_v46 }
  0x45   :  { %741 = vmatprep.subr.bf16.mxu1 %v1101_v48  ;;  %720 = vmatpush3.bf16.msra.mxu0 %v1105_v49 }
  0x46   :  { %749 = vmatprep.subr.bf16.mxu0 %v1013_v4 }
  0x48   :  { %742 = vmatpush3.bf16.msra.mxu1 %v1109_v51 }
  0x49   :  { %771 = vmatprep.subr.bf16.mxu1 %v1017_v6 }
  0x99   :  { %v52_v20 = vpop.permute.xlu1 %51  ;;  %v48_v21 = vpop.permute.xlu0 %47 }
  0x9d   :  { %v54_v26 = vpop.permute.xlu1 %53  ;;  %v50_v27 = vpop.permute.xlu0 %49 }
  0x9e   :  { %v58_v29 = vsel %vm57_vm0, %v52_v20, %v54_v26  ;;  %v61_v30 = vsel %vm57_vm0, %v54_v26, %v48_v21  ;;  %v59_v31 = vsel %vm57_vm0, %v50_v27, %v52_v20  ;;  %v60_v32 = vsel %vm57_vm0, %v48_v21, %v50_v27 }
  0x9f   :  { %v67_v34 = vcombine.low %v58_v29, %v61_v30  ;;  %v66_v35 = vcombine.low %v60_v32, %v59_v31 }
  0xa1   :  { %v70_v38 = vmax.f32 %v1005_v1, %v66_v35  ;;  %v71_v42 = vmax.f32 %v1003_v0, %v67_v34 }
  0xa3   :  { %78 = vrot.lane.b32.xlu0 %v70_v38, %s955_s1  ;;  %v74_v41 = vcombine.high %v70_v38, %v70_v38  ;;  %v75_v50 = vcombine.high %v71_v42, %v71_v42 }
  0xa5   :  { %80 = vrot.lane.b32.xlu1 %v74_v41, %s955_s1 }
  0xa7   :  { %82 = vrot.lane.b32.xlu0 %v71_v42, %s955_s1 }
  0xa9   :  { %84 = vrot.lane.b32.xlu1 %v75_v50, %s955_s1 }
 0x115   :  { %v79_v52 = vpop.permute.xlu0 %78 }
 0x117   :  { %v81_v53 = vpop.permute.xlu1 %80 }
 0x118   :  { %v89_v55 = vsel %vm86_vm1, %v79_v52, %v81_v53 }
 0x119   :  { %v83_v54 = vpop.permute.xlu0 %82 }
 0x11a   :  { %v88_v56 = vsel %vm86_vm1, %v81_v53, %v83_v54 }
 0x11b   :  { %v95_v57 = vcombine.low %v89_v55, %v88_v56  ;;  %v85_v58 = vpop.permute.xlu1 %84 }
 0x11c   :  { %v87_v59 = vsel %vm86_vm1, %v83_v54, %v85_v58  ;;  %v90_v60 = vsel %vm86_vm1, %v85_v58, %v79_v52 }
 0x11d   :  { %v99_v61 = vmax.f32 %v70_v38, %v95_v57  ;;  %v96_v62 = vcombine.low %v87_v59, %v90_v60 }
 0x11f   :  { %v167_v63 = vcombine.high %v99_v61, %v99_v61  ;;  %v1117_v0 = vpack.c.bf16 %v99_v61, %v99_v61  ;;  %v100_v1 = vmax.f32 %v71_v42, %v96_v62 }
 0x121   :  { %v172_v2 = vpack.c.bf16 %v167_v63, %v167_v63  ;;  %v168_v3 = vcombine.high %v100_v1, %v100_v1  ;;  %v1119_v13 = vpack.c.bf16 %v100_v1, %v100_v1  ;;  %v175_v17 = vunpack.c.l.bf16 %v1117_v0 }
 0x123   :  { %v174_v20 = vpack.c.bf16 %v168_v3, %v168_v3  ;;  %v176_v21 = vunpack.c.l.bf16 %v172_v2  ;;  %v177_v27 = vunpack.c.l.bf16 %v1119_v13 }
 0x125   :  { %v183_v26 = vcombine.low %v175_v17, %v176_v21  ;;  %v178_v29 = vunpack.c.l.bf16 %v174_v20 }
 0x127   :  { %v187_v30 = vsub.f32 %v99_v61, %v183_v26  ;;  %v184_v31 = vcombine.low %v177_v27, %v178_v29 }
 0x129   :  { %v191_v32 = vcombine.high %v187_v30, %v187_v30  ;;  %v188_v34 = vsub.f32 %v100_v1, %v184_v31  ;;  %v195_v41 = vpack.c.bf16 %v187_v30, %v187_v30 }
 0x12b   :  { %v196_v35 = vpack.c.bf16 %v191_v32, %v191_v32  ;;  %v192_v38 = vcombine.high %v188_v34, %v188_v34  ;;  %v197_v50 = vpack.c.bf16 %v188_v34, %v188_v34  ;;  %v199_v53 = vunpack.c.l.bf16 %v195_v41 }
 0x12d   :  { %447 = vmatprep.mubr.bf16.mxu0 %v196_v35  ;;  %v198_v42 = vpack.c.bf16 %v192_v38, %v192_v38  ;;  %v200_v52 = vunpack.c.l.bf16 %v196_v35  ;;  %v201_v56 = vunpack.c.l.bf16 %v197_v50 }
 0x12e   :  { %448 = vmatmul.mubr.bf16.vlgmr.msra.gmra.mrb[0].mxu0 %v195_v41 }
 0x12f   :  { %750 = vmatpush3.bf16.msra.mxu0 %v1015_v5  ;;  %487 = vmatprep.mubr.bf16.mxu1 %v198_v42  ;;  %v202_v54 = vunpack.c.l.bf16 %v198_v42  ;;  %v207_v55 = vcombine.low %v199_v53, %v200_v52 }
 0x130   :  { %527 = vmatprep.mubr.bf16.mxu0 %v172_v2  ;;  %488 = vmatmul.mubr.bf16.vlgmr.msra.gmra.mrb[0].mxu1 %v197_v50 }
 0x131   :  { %772 = vmatpush3.bf16.msra.mxu1 %v1019_v7  ;;  %751 = vmatprep.subr.bf16.mxu0 %v1021_v8  ;;  %v208_v57 = vcombine.low %v201_v56, %v202_v54  ;;  %v211_v58 = vsub.f32 %v187_v30, %v207_v55 }
 0x132   :  { %567 = vmatprep.mubr.bf16.mxu1 %v174_v20  ;;  %773 = vmatprep.subr.bf16.mxu1 %v1029_v10 }
 0x133   :  { %752 = vmatpush3.bf16.msra.mxu0 %v1025_v9  ;;  %v212_v59 = vsub.f32 %v188_v34, %v208_v57  ;;  %v215_v60 = vcombine.high %v211_v58, %v211_v58 }
 0x134   :  { %753 = vmatprep.subr.bf16.mxu0 %v1035_v12 }
 0x135   :  { %774 = vmatpush3.bf16.msra.mxu1 %v1032_v11  ;;  %v216_v61 = vcombine.high %v212_v59, %v212_v59  ;;  %v220_v62 = vpack.c.bf16 %v215_v60, %v215_v60 }
 0x136   :  { %775 = vmatprep.subr.bf16.mxu1 %v1042_v15 }
 0x137   :  { %754 = vmatpush3.bf16.msra.mxu0 %v1040_v14  ;;  %v222_v63 = vpack.c.bf16 %v216_v61, %v216_v61 }
 0x138   :  { %755 = vmatprep.subr.bf16.mxu0 %v1050_v18 }
 0x139   :  { %776 = vmatpush3.bf16.msra.mxu1 %v1045_v16 }
 0x13a   :  { %777 = vmatprep.subr.bf16.mxu1 %v1056_v22 }
 0x13b   :  { %756 = vmatpush3.bf16.msra.mxu0 %v1053_v19 }
 0x13c   :  { %757 = vmatprep.subr.bf16.mxu0 %v1063_v24 }
 0x13d   :  { %778 = vmatpush3.bf16.msra.mxu1 %v1059_v23 }
 0x13e   :  { %779 = vmatprep.subr.bf16.mxu1 %v1069_v28 }
 0x13f   :  { %758 = vmatpush3.bf16.msra.mxu0 %v1066_v25 }
 0x140   :  { %759 = vmatprep.subr.bf16.mxu0 %v1075_v36 }
 0x141   :  { %780 = vmatpush3.bf16.msra.mxu1 %v1072_v33 }
 0x142   :  { %781 = vmatprep.subr.bf16.mxu1 %v1082_v39 }
 0x143   :  { %760 = vmatpush3.bf16.msra.mxu0 %v1078_v37 }
 0x144   :  { %761 = vmatprep.subr.bf16.mxu0 %v1089_v43 }
 0x145   :  { %782 = vmatpush3.bf16.msra.mxu1 %v1085_v40 }
 0x146   :  { %783 = vmatprep.subr.bf16.mxu1 %v1093_v45 }
 0x147   :  { %762 = vmatpush3.bf16.msra.mxu0 %v1091_v44 }
 0x148   :  { %763 = vmatprep.subr.bf16.mxu0 %v1098_v47 }
 0x149   :  { %784 = vmatpush3.bf16.msra.mxu1 %v1096_v46 }
 0x14a   :  { %785 = vmatprep.subr.bf16.mxu1 %v1101_v48 }
 0x14b   :  { %764 = vmatpush3.bf16.msra.mxu0 %v1105_v49 }
 0x14c   :  { %793 = vmatprep.subr.bf16.mxu0 %v1013_v4  ;;  %v219_v4 = vpack.c.bf16 %v211_v58, %v211_v58 }
 0x14d   :  { %786 = vmatpush3.bf16.msra.mxu1 %v1109_v51 }
 0x14e   :  { %528 = vmatmul.mubr.bf16.vlgmr.msra.gmra.mrb[4].mxu0 %v1117_v0  ;;  %815 = vmatprep.subr.bf16.mxu1 %v1017_v6 }
 0x14f   :  { %794 = vmatpush3.bf16.msra.mxu0 %v1015_v5  ;;  %607 = vmatprep.mubr.bf16.mxu0 %v220_v62  ;;  %v221_v5 = vpack.c.bf16 %v212_v59, %v212_v59 }
 0x150   :  { %568 = vmatmul.mubr.bf16.vlgmr.msra.gmra.mrb[4].mxu1 %v1119_v13  ;;  %795 = vmatprep.subr.bf16.mxu0 %v1021_v8 }
 0x151   :  { %816 = vmatpush3.bf16.msra.mxu1 %v1019_v7  ;;  %647 = vmatprep.mubr.bf16.mxu1 %v222_v63 }
 0x152   :  { %817 = vmatprep.subr.bf16.mxu1 %v1029_v10 }
 0x153   :  { %796 = vmatpush3.bf16.msra.mxu0 %v1025_v9 }
 0x154   :  { %797 = vmatprep.subr.bf16.mxu0 %v1035_v12 }
 0x155   :  { %818 = vmatpush3.bf16.msra.mxu1 %v1032_v11 }
 0x156   :  { %819 = vmatprep.subr.bf16.mxu1 %v1042_v15 }
 0x157   :  { %798 = vmatpush3.bf16.msra.mxu0 %v1040_v14 }
 0x158   :  { %799 = vmatprep.subr.bf16.mxu0 %v1050_v18 }
 0x159   :  { %820 = vmatpush3.bf16.msra.mxu1 %v1045_v16 }
 0x15a   :  { %821 = vmatprep.subr.bf16.mxu1 %v1056_v22 }
 0x15b   :  { %800 = vmatpush3.bf16.msra.mxu0 %v1053_v19 }
 0x15c   :  { %801 = vmatprep.subr.bf16.mxu0 %v1063_v24 }
 0x15d   :  { %822 = vmatpush3.bf16.msra.mxu1 %v1059_v23 }
 0x15e   :  { %823 = vmatprep.subr.bf16.mxu1 %v1069_v28 }
 0x15f   :  { %802 = vmatpush3.bf16.msra.mxu0 %v1066_v25 }
 0x160   :  { %803 = vmatprep.subr.bf16.mxu0 %v1075_v36 }
 0x161   :  { %824 = vmatpush3.bf16.msra.mxu1 %v1072_v33 }
 0x162   :  { %825 = vmatprep.subr.bf16.mxu1 %v1082_v39 }
 0x163   :  { %804 = vmatpush3.bf16.msra.mxu0 %v1078_v37 }
 0x164   :  { %805 = vmatprep.subr.bf16.mxu0 %v1089_v43 }
 0x165   :  { %826 = vmatpush3.bf16.msra.mxu1 %v1085_v40 }
 0x166   :  { %827 = vmatprep.subr.bf16.mxu1 %v1093_v45 }
 0x167   :  { %806 = vmatpush3.bf16.msra.mxu0 %v1091_v44 }
 0x168   :  { %807 = vmatprep.subr.bf16.mxu0 %v1098_v47 }
 0x169   :  { %828 = vmatpush3.bf16.msra.mxu1 %v1096_v46 }
 0x16a   :  { %829 = vmatprep.subr.bf16.mxu1 %v1101_v48 }
 0x16b   :  { %808 = vmatpush3.bf16.msra.mxu0 %v1105_v49 }
 0x16d   :  { %830 = vmatpush3.bf16.msra.mxu1 %v1109_v51 }
 0x16e   :  { %608 = vmatmul.mubr.bf16.vlgmr.msra.gmra.mrb[8].mxu0 %v219_v4 }
 0x170   :  { %648 = vmatmul.mubr.bf16.vlgmr.msra.gmra.mrb[8].mxu1 %v221_v5 }
 0x201   :  { %v721_v6 = vpop.f32.mrb[0].mxu0 }
 0x202   :  { %v722_v7 = vpop.f32.mrb[1].mxu0 }
 0x203   :  { %v723_v8 = vadd.f32 %v722_v7, %v721_v6  ;;  %v724_v9 = vpop.f32.mrb[2].mxu0  ;;  %v743_v10 = vpop.f32.mrb[0].mxu1 }
 0x204   :  { %v725_v11 = vpop.f32.mrb[3].mxu0  ;;  %v744_v12 = vpop.f32.mrb[1].mxu1 }
 0x205   :  { %v745_v14 = vadd.f32 %v744_v12, %v743_v10  ;;  %v746_v15 = vpop.f32.mrb[2].mxu1 }
 0x206   :  { %v747_v16 = vpop.f32.mrb[3].mxu1 }
 0x207   :  { %v490_v18 = vadd.f32 %v745_v14, %v723_v8 }
 0x221   :  { %v765_v19 = vpop.f32.mrb[4].mxu0 }
 0x222   :  { %v766_v22 = vpop.f32.mrb[5].mxu0 }
 0x223   :  { %v767_v23 = vadd.f32 %v766_v22, %v765_v19  ;;  %v768_v24 = vpop.f32.mrb[6].mxu0  ;;  %v787_v25 = vpop.f32.mrb[4].mxu1 }
 0x224   :  { %v769_v28 = vpop.f32.mrb[7].mxu0  ;;  %v788_v33 = vpop.f32.mrb[5].mxu1 }
 0x225   :  { %v530_v36 = vadd.f32 %v767_v23, %v490_v18  ;;  %v789_v37 = vadd.f32 %v788_v33, %v787_v25  ;;  %v790_v39 = vpop.f32.mrb[6].mxu1 }
 0x226   :  { %v791_v40 = vpop.f32.mrb[7].mxu1 }
 0x227   :  { %v570_v43 = vadd.f32 %v789_v37, %v530_v36 }
 0x241   :  { %v809_v44 = vpop.f32.mrb[8].mxu0 }
 0x242   :  { %v810_v45 = vpop.f32.mrb[9].mxu0 }
 0x243   :  { %v811_v46 = vadd.f32 %v810_v45, %v809_v44  ;;  %v812_v47 = vpop.f32.mrb[10].mxu0  ;;  %v831_v48 = vpop.f32.mrb[8].mxu1 }
 0x244   :  { %v813_v49 = vpop.f32.mrb[11].mxu0  ;;  %v832_v51 = vpop.f32.mrb[9].mxu1 }
 0x245   :  { %v833_v0 = vadd.f32 %v832_v51, %v831_v48  ;;  %v834_v1 = vpop.f32.mrb[10].mxu1 }
 0x246   :  { %v835_v2 = vpop.f32.mrb[11].mxu1 }
 0x247   :  { %v650_v3 = vadd.f32 %v833_v0, %v811_v46 }
 0x249   :  { %v655_v13 = vadd.f32 %v650_v3, %v570_v43 }
 0x24b   :  { %656 = vst [vmem:[#allocation7] sm:$0xf] %v655_v13 }
 0x24c   :  { %933 = shalt.err (!%p930_p6)
}
 0x24d   :  { %s934_s12 = scalar_lea.hbm %s1201_s2, 64 }
 0x24e   :  { %p935_p7 = scmp.ne.s32.totalorder %s1201_s2, %s934_s12  ;;  %p938_p8 = scmp.lt.u32.totalorder %s934_s12, %s1201_s2 }
 0x250   :  { %p940_p9 = pnand %p938_p8, %p935_p7 }
 0x252   :  { %943 = shalt.err (!%p940_p9)
}
 0x253   :  { %666 = dma.vmem_to_hbm [thread:$0]  %s664_s8, 64, %s1201_s2, [#allocation4]  }
 0x254   :  { %948 = dma.done.wait [#allocation4], 64  }
 0x255   :  { %949 = vsyncadd [#allocation4], 4294967232 }
 0x256   :  { %670 = vsyncpa [#allocation3], 1 }
 0x257   :  { %671 = vsyncpa [#allocation6], 1 }
 0x258   :  { %672 = vsyncpa [#allocation4], 1 }

</bundles_post_ra>
